<compile_context>
chip_gen: v7x
topology: tpu7x:2x2x1
jax: 0.10.0
libtpu: 0.0.40
codegen_flags: <defaults>
</compile_context>

<pallas_src>
import functools

import jax
import jax.numpy as jnp
import numpy as np
from jax.experimental import pallas as pl
from jax.experimental.pallas import tpu as pltpu


# ----------------------------------------------------------------------------
# The single fused Pallas kernel
# ----------------------------------------------------------------------------
def _fused_forward_kernel(att_ref,    # SMEM (L*R*B,) f32  basis-decomposition coefficients
                          emb_a_ref,  # VMEM (Na, C)       author embedding table
                          feat_p_ref, # VMEM (Np, Fin)     paper raw features
                          wp_ref,     # VMEM (Fin, C)      paper Linear weight, pre-transposed (in, out)
                          bp_ref,     # VMEM (1, C)        paper Linear bias
                          a_ref,      # VMEM (R, N, N)     row-normalized relational adjacency
                          basis_ref,  # VMEM (L, C, B*C)   per-layer bases, concatenated along out-channels
                          bias_ref,   # VMEM (L, 1, C)     per-layer conv bias
                          o_ref,      # VMEM (N, C)        final node embeddings
                          x_ref):     # VMEM scratch (N, C) current node embeddings
    L, _, bc = basis_ref.shape
    c_out = bias_ref.shape[-1]
    B = bc // c_out
    R, N, _ = a_ref.shape
    Na = emb_a_ref.shape[0]

    # -- 1) per-node-type input projection, assembled via ref stores ---------
    #    author rows [0, Na): Embedding(arange(Na)) == the full table (copy)
    #    paper  rows [Na, N): x @ W^T + b  (weight pre-transposed in wrapper)
    x_ref[0:Na, :] = emb_a_ref[...]
    x_ref[Na:N, :] = (jnp.dot(feat_p_ref[...], wp_ref[...],
                              preferred_element_type=jnp.float32)
                      + bp_ref[...])
    x = x_ref[...]                                                     # (N, C)

    # -- 2) RGCN layers, fully unrolled, att folded into the adjacency -------
    for l in range(L):
        # merged basis projection: one (N, C) @ (C, B*C) MXU call per layer
        xb = jnp.dot(x, basis_ref[l], preferred_element_type=jnp.float32)
        out = bias_ref[l]                                              # (1, C) broadcast seed
        for b in range(B):
            # fold att into adjacency: M_b = sum_r att[l,r,b] * A[r]   (VPU, 64x64)
            m_b = att_ref[(l * R) * B + b] * a_ref[0]
            for r in range(1, R):
                m_b = m_b + att_ref[(l * R + r) * B + b] * a_ref[r]
            # aggregate the pre-projected features                     (MXU)
            out = out + jnp.dot(m_b, xb[:, b * c_out:(b + 1) * c_out],
                                preferred_element_type=jnp.float32)
        x = jnp.maximum(out, 0.0) if l < L - 1 else out                # ReLU between layers

    o_ref[...] = x


def fused_forward(att_flat, emb_a, feat_p, wpT, bp, A, basis_cat, bias_all):
    n_total = A.shape[1]
    c_max = bias_all.shape[-1]
    vmem = pl.BlockSpec(memory_space=pltpu.MemorySpace.VMEM)
    smem = pl.BlockSpec(memory_space=pltpu.MemorySpace.SMEM)
    return pl.pallas_call(
        _fused_forward_kernel,
        out_shape=jax.ShapeDtypeStruct((n_total, c_max), jnp.float32),
        in_specs=[smem, vmem, vmem, vmem, vmem, vmem, vmem, vmem],
        out_specs=vmem,
        scratch_shapes=[pltpu.VMEM((n_total, c_max), jnp.float32)],
    )(att_flat, emb_a, feat_p, wpT, bp, A, basis_cat, bias_all)


# ----------------------------------------------------------------------------
# Glue: parameter init, dense normalized adjacency, per-layer stacking
# ----------------------------------------------------------------------------
def xavier_uniform(key, shape, gain):
    fan_in, fan_out = shape[-2], shape[-1]
    bound = gain * np.sqrt(6.0 / (fan_in + fan_out))
    return jax.random.uniform(key, shape, jnp.float32, -bound, bound)


def build_norm_adjacency(triples, num_nodes, num_rels):
    """Dense equivalent of stack_matrices + sum_sparse normalization + spmm operand.

    A[r, i, j] = (# edges (i, r, j)) / deg_r(i), where deg_r(i) counts all
    edges with source i and relation r (including multiplicity).
    """
    src, rel, dst = triples[:, 0], triples[:, 1], triples[:, 2]
    counts = jnp.zeros((num_rels, num_nodes, num_nodes), jnp.float32)
    counts = counts.at[rel, src, dst].add(1.0)
    deg = counts.sum(axis=2, keepdims=True)
    return jnp.where(deg > 0, counts / jnp.maximum(deg, 1.0), 0.0)


def _pad2(a, rows, cols):
    return jnp.pad(a, ((0, rows - a.shape[0]), (0, cols - a.shape[1])))


def make_params(key, *, in_channels_dict, num_nodes_per_type, mlp_out,
                conv_channels, num_relations, num_bases, num_layers):
    gain = float(np.sqrt(2.0))  # calculate_gain('relu')
    keys = jax.random.split(key, 16)
    ki = iter(range(16))
    params = {}

    # relation embedding (unused in forward, kept for parity with __init__)
    params["relation_embedding"] = xavier_uniform(
        keys[next(ki)], (num_relations, conv_channels[num_layers - 1]), gain)

    # input MLPs / embeddings
    params["mlp"] = {}
    for node_type, in_c in in_channels_dict.items():
        if in_c is None:
            params["mlp"][node_type] = {
                "embedding": jax.random.normal(
                    keys[next(ki)], (num_nodes_per_type[node_type], mlp_out),
                    jnp.float32)
            }
        else:
            lim = 1.0 / np.sqrt(in_c)
            params["mlp"][node_type] = {
                "weight": jax.random.uniform(
                    keys[next(ki)], (mlp_out, in_c), jnp.float32, -lim, lim),
                "bias": jax.random.uniform(
                    keys[next(ki)], (mlp_out,), jnp.float32, -lim, lim),
            }

    # RGCN conv layers (basis decomposition)
    params["conv"] = []
    in_c = mlp_out
    for layer in range(num_layers):
        out_c = conv_channels[layer]
        params["conv"].append({
            "basis": xavier_uniform(keys[next(ki)], (num_bases, in_c, out_c), gain),
            "att": xavier_uniform(keys[next(ki)], (num_relations, num_bases), gain),
            "bias": jax.random.uniform(keys[next(ki)], (out_c,), jnp.float32, 0.0, 1.0),
        })
        in_c = out_c
    return params


@functools.partial(jax.jit, static_argnames=("num_nodes", "num_relations"))
def hetero_rgcn_forward(params, x_dict, edge_index, *, num_nodes, num_relations):
    """Full forward.  Everything inside one fused Pallas kernel; only the dense
    normalized adjacency construction (scatter-add) and the per-layer parameter
    stacking are done as XLA glue."""
    mlp = params["mlp"]

    # Node-type layout (matches the reference's sorted-key concat order):
    #   rows [0, Na)   : "author" (Embedding table)
    #   rows [Na, N)   : "paper"  (Linear projection)
    # Guard against silent row misalignment if node types ever change.
    assert sorted(mlp.keys()) == ["author", "paper"]
    assert "embedding" in mlp["author"] and "weight" in mlp["paper"]

    mlp_out = mlp["author"]["embedding"].shape[1]
    conv_out = [p["bias"].shape[0] for p in params["conv"]]
    c_max = max([mlp_out] + conv_out)          # carried channel width (32 here)

    emb_a = _pad2(mlp["author"]["embedding"],
                  mlp["author"]["embedding"].shape[0], c_max)            # (Na, C)
    feat_p = x_dict["paper"]                                             # (Np, Fin) natural size
    wpT = _pad2(mlp["paper"]["weight"].T,
                mlp["paper"]["weight"].shape[1], c_max)                  # (Fin, C) pre-transposed
    bp = _pad2(mlp["paper"]["bias"].reshape(1, -1), 1, c_max)            # (1, C)

    # dense row-normalized relational adjacency (glue; densified spmm)
    # TODO(synk): replace with COO scalar-prefetch SpMM at scale.
    A = build_norm_adjacency(edge_index, num_nodes, num_relations)       # (R, N, N)

    # per-layer bases, padded to (C, C) and concatenated along out-channels
    # so the projection is one wide matmul per layer: (L, C, B*C)
    basis_cat = jnp.stack([
        jnp.pad(p["basis"],
                ((0, 0),
                 (0, c_max - p["basis"].shape[1]),
                 (0, c_max - p["basis"].shape[2]))
                ).transpose(1, 0, 2).reshape(c_max, -1)
        for p in params["conv"]])                                        # (L, C, B*C)
    att_flat = jnp.concatenate(
        [p["att"].reshape(-1) for p in params["conv"]])                  # (L*R*B,) SMEM scalars
    bias_all = jnp.stack(
        [_pad2(p["bias"].reshape(1, -1), 1, c_max) for p in params["conv"]])  # (L, 1, C)

    out = fused_forward(att_flat, emb_a, feat_p, wpT, bp,
                        A, basis_cat, bias_all)                          # (N, C)
    return out[:, :conv_out[-1]]


def reference_forward(params, x_dict, edge_index, *, num_nodes, num_relations):
    """Pure-JAX reference for correctness checking (mirrors the torch module)."""
    x_list = []
    for node_type in sorted(params["mlp"].keys()):
        p = params["mlp"][node_type]
        if "embedding" in p:
            x_list.append(p["embedding"])
        else:
            x_list.append(x_dict[node_type] @ p["weight"].T + p["bias"])
    x = jnp.concatenate(x_list, axis=0)
    A = build_norm_adjacency(edge_index, num_nodes, num_relations)
    num_layers = len(params["conv"])
    for layer, p in enumerate(params["conv"]):
        W = jnp.einsum("rb,bio->rio", p["att"], p["basis"])
        af = jnp.einsum("rnm,mi->rni", A, x)
        x = jnp.einsum("rio,rni->no", W, af) + p["bias"]
        if layer < num_layers - 1:
            x = jax.nn.relu(x)
    return x


# ----------------------------------------------------------------------------
if __name__ == "__main__":
    # Small synthetic configuration
    NUM_RELATIONS = 3
    NUM_BASES = 2
    MLP_OUT = 32
    CONV_CHANNELS = {0: 32, 1: 32}
    NUM_LAYERS = 2
    NUM_NODES_PER_TYPE = {"author": 32, "paper": 32}
    NUM_ENTITIES = sum(NUM_NODES_PER_TYPE.values())  # 64
    IN_CHANNELS_DICT = {"author": None, "paper": 16}  # author uses Embedding
    NUM_EDGES = 200

    root = jax.random.PRNGKey(0)
    k_param, k_feat, k_src, k_rel, k_dst = jax.random.split(root, 5)

    params = make_params(
        k_param,
        in_channels_dict=IN_CHANNELS_DICT,
        num_nodes_per_type=NUM_NODES_PER_TYPE,
        mlp_out=MLP_OUT,
        conv_channels=CONV_CHANNELS,
        num_relations=NUM_RELATIONS,
        num_bases=NUM_BASES,
        num_layers=NUM_LAYERS,
    )

    x_dict = {
        "author": None,
        "paper": jax.random.normal(k_feat, (NUM_NODES_PER_TYPE["paper"], 16),
                                   jnp.float32),
    }
    edge_index = jnp.stack(
        [
            jax.random.randint(k_src, (NUM_EDGES,), 0, NUM_ENTITIES),
            jax.random.randint(k_rel, (NUM_EDGES,), 0, NUM_RELATIONS),
            jax.random.randint(k_dst, (NUM_EDGES,), 0, NUM_ENTITIES),
        ],
        axis=1,
    ).astype(jnp.int32)  # (E, 3) columns [src, rel, dst], torch.long -> int32

    out = hetero_rgcn_forward(
        params, x_dict, edge_index,
        num_nodes=NUM_ENTITIES, num_relations=NUM_RELATIONS)
    out = jax.block_until_ready(out)

    ref = reference_forward(
        params, x_dict, edge_index,
        num_nodes=NUM_ENTITIES, num_relations=NUM_RELATIONS)
    np.testing.assert_allclose(np.asarray(out), np.asarray(ref),
                               rtol=1e-4, atol=1e-4)
    assert out.shape == (NUM_ENTITIES, CONV_CHANNELS[NUM_LAYERS - 1])

    print("KERNEL_OK")
</pallas_src>

<mosaic_0001>
module attributes {stable_mosaic.version = 11 : i64} {
  func.func @_fused_forward_kernel(%arg0: memref<12xf32, #tpu.memory_space<smem>>, %arg1: memref<32x32xf32, #tpu.memory_space<vmem>>, %arg2: memref<32x16xf32, #tpu.memory_space<vmem>>, %arg3: memref<16x32xf32, #tpu.memory_space<vmem>>, %arg4: memref<1x32xf32, #tpu.memory_space<vmem>>, %arg5: memref<3x64x64xf32, #tpu.memory_space<vmem>>, %arg6: memref<2x32x64xf32, #tpu.memory_space<vmem>>, %arg7: memref<2x1x32xf32, #tpu.memory_space<vmem>>, %arg8: memref<64x32xf32, #tpu.memory_space<vmem>>, %arg9: memref<64x32xf32, #tpu.memory_space<vmem>>) attributes {dimension_semantics = [], scalar_prefetch = 0 : i64, scratch_operands = 1 : i64, tpu.core_type = #tpu.core_type<tc>} {
    %c0 = arith.constant 0 : index
    %c0_0 = arith.constant 0 : index
    %0 = vector.load %arg1[%c0, %c0_0] : memref<32x32xf32, #tpu.memory_space<vmem>>, vector<32x32xf32>
    %c0_1 = arith.constant 0 : index
    %c0_2 = arith.constant 0 : index
    %1 = vector.load %arg9[%c0_1, %c0_2] : memref<64x32xf32, #tpu.memory_space<vmem>>, vector<32x32xf32>
    tpu.vector_store %arg9[%c0_1, %c0_2], %0 {strides = array<i32>} : memref<64x32xf32, #tpu.memory_space<vmem>>, vector<32x32xf32>,
    %c0_3 = arith.constant 0 : index
    %c0_4 = arith.constant 0 : index
    %2 = vector.load %arg2[%c0_3, %c0_4] : memref<32x16xf32, #tpu.memory_space<vmem>>, vector<32x16xf32>
    %c0_5 = arith.constant 0 : index
    %c0_6 = arith.constant 0 : index
    %3 = vector.load %arg3[%c0_5, %c0_6] : memref<16x32xf32, #tpu.memory_space<vmem>>, vector<16x32xf32>
    %cst = arith.constant dense<0.000000e+00> : vector<32x32xf32>
    %4 = tpu.matmul %2, %3, %cst {dimension_numbers = #tpu.dot_dimension_numbers<[1], [0], [0], [1], [0, 0, 1, 1], [], []>} : vector<32x16xf32>, vector<16x32xf32>, vector<32x32xf32> -> vector<32x32xf32>
    %c0_7 = arith.constant 0 : index
    %c0_8 = arith.constant 0 : index
    %5 = vector.load %arg4[%c0_7, %c0_8] : memref<1x32xf32, #tpu.memory_space<vmem>>, vector<1x32xf32>
    %6 = vector.broadcast %5 : vector<1x32xf32> to vector<32x32xf32>
    %7 = arith.addf %4, %6 : vector<32x32xf32>
    %c32 = arith.constant 32 : index
    %c0_9 = arith.constant 0 : index
    %8 = vector.load %arg9[%c32, %c0_9] : memref<64x32xf32, #tpu.memory_space<vmem>>, vector<32x32xf32>
    tpu.vector_store %arg9[%c32, %c0_9], %7 {strides = array<i32>} : memref<64x32xf32, #tpu.memory_space<vmem>>, vector<32x32xf32>,
    %c0_10 = arith.constant 0 : index
    %c0_11 = arith.constant 0 : index
    %9 = vector.load %arg9[%c0_10, %c0_11] : memref<64x32xf32, #tpu.memory_space<vmem>>, vector<64x32xf32>
    %c0_12 = arith.constant 0 : index
    %c0_13 = arith.constant 0 : index
    %c0_14 = arith.constant 0 : index
    %10 = vector.load %arg6[%c0_12, %c0_13, %c0_14] : memref<2x32x64xf32, #tpu.memory_space<vmem>>, vector<1x32x64xf32>
    %11 = vector.shape_cast %10 : vector<1x32x64xf32> to vector<32x64xf32>
    %cst_15 = arith.constant dense<0.000000e+00> : vector<64x64xf32>
    %12 = tpu.matmul %9, %11, %cst_15 {dimension_numbers = #tpu.dot_dimension_numbers<[1], [0], [0], [1], [0, 0, 1, 1], [], []>} : vector<64x32xf32>, vector<32x64xf32>, vector<64x64xf32> -> vector<64x64xf32>
    %c0_16 = arith.constant 0 : index
    %c0_17 = arith.constant 0 : index
    %c0_18 = arith.constant 0 : index
    %13 = vector.load %arg7[%c0_16, %c0_17, %c0_18] : memref<2x1x32xf32, #tpu.memory_space<vmem>>, vector<1x1x32xf32>
    %14 = vector.shape_cast %13 : vector<1x1x32xf32> to vector<1x32xf32>
    %c0_19 = arith.constant 0 : index
    %15 = memref.load %arg0[%c0_19] : memref<12xf32, #tpu.memory_space<smem>>
    %c0_20 = arith.constant 0 : index
    %c0_21 = arith.constant 0 : index
    %c0_22 = arith.constant 0 : index
    %16 = vector.load %arg5[%c0_20, %c0_21, %c0_22] : memref<3x64x64xf32, #tpu.memory_space<vmem>>, vector<1x64x64xf32>
    %17 = vector.shape_cast %16 : vector<1x64x64xf32> to vector<64x64xf32>
    %18 = vector.broadcast %15 : f32 to vector<64x64xf32>
    %19 = arith.mulf %18, %17 : vector<64x64xf32>
    %c2 = arith.constant 2 : index
    %20 = memref.load %arg0[%c2] : memref<12xf32, #tpu.memory_space<smem>>
    %c1 = arith.constant 1 : index
    %c0_23 = arith.constant 0 : index
    %c0_24 = arith.constant 0 : index
    %21 = vector.load %arg5[%c1, %c0_23, %c0_24] : memref<3x64x64xf32, #tpu.memory_space<vmem>>, vector<1x64x64xf32>
    %22 = vector.shape_cast %21 : vector<1x64x64xf32> to vector<64x64xf32>
    %23 = vector.broadcast %20 : f32 to vector<64x64xf32>
    %24 = arith.mulf %23, %22 : vector<64x64xf32>
    %25 = arith.addf %19, %24 : vector<64x64xf32>
    %c4 = arith.constant 4 : index
    %26 = memref.load %arg0[%c4] : memref<12xf32, #tpu.memory_space<smem>>
    %c2_25 = arith.constant 2 : index
    %c0_26 = arith.constant 0 : index
    %c0_27 = arith.constant 0 : index
    %27 = vector.load %arg5[%c2_25, %c0_26, %c0_27] : memref<3x64x64xf32, #tpu.memory_space<vmem>>, vector<1x64x64xf32>
    %28 = vector.shape_cast %27 : vector<1x64x64xf32> to vector<64x64xf32>
    %29 = vector.broadcast %26 : f32 to vector<64x64xf32>
    %30 = arith.mulf %29, %28 : vector<64x64xf32>
    %31 = arith.addf %25, %30 : vector<64x64xf32>
    %32 = vector.extract_strided_slice %12 {offsets = [0, 0], sizes = [64, 32], strides = [1, 1]} : vector<64x64xf32> to vector<64x32xf32>
    %cst_28 = arith.constant dense<0.000000e+00> : vector<64x32xf32>
    %33 = tpu.matmul %31, %32, %cst_28 {dimension_numbers = #tpu.dot_dimension_numbers<[1], [0], [0], [1], [0, 0, 1, 1], [], []>} : vector<64x64xf32>, vector<64x32xf32>, vector<64x32xf32> -> vector<64x32xf32>
    %34 = vector.broadcast %14 : vector<1x32xf32> to vector<64x32xf32>
    %35 = arith.addf %34, %33 : vector<64x32xf32>
    %c1_29 = arith.constant 1 : index
    %36 = memref.load %arg0[%c1_29] : memref<12xf32, #tpu.memory_space<smem>>
    %c0_30 = arith.constant 0 : index
    %c0_31 = arith.constant 0 : index
    %c0_32 = arith.constant 0 : index
    %37 = vector.load %arg5[%c0_30, %c0_31, %c0_32] : memref<3x64x64xf32, #tpu.memory_space<vmem>>, vector<1x64x64xf32>
    %38 = vector.shape_cast %37 : vector<1x64x64xf32> to vector<64x64xf32>
    %39 = vector.broadcast %36 : f32 to vector<64x64xf32>
    %40 = arith.mulf %39, %38 : vector<64x64xf32>
    %c3 = arith.constant 3 : index
    %41 = memref.load %arg0[%c3] : memref<12xf32, #tpu.memory_space<smem>>
    %c1_33 = arith.constant 1 : index
    %c0_34 = arith.constant 0 : index
    %c0_35 = arith.constant 0 : index
    %42 = vector.load %arg5[%c1_33, %c0_34, %c0_35] : memref<3x64x64xf32, #tpu.memory_space<vmem>>, vector<1x64x64xf32>
    %43 = vector.shape_cast %42 : vector<1x64x64xf32> to vector<64x64xf32>
    %44 = vector.broadcast %41 : f32 to vector<64x64xf32>
    %45 = arith.mulf %44, %43 : vector<64x64xf32>
    %46 = arith.addf %40, %45 : vector<64x64xf32>
    %c5 = arith.constant 5 : index
    %47 = memref.load %arg0[%c5] : memref<12xf32, #tpu.memory_space<smem>>
    %c2_36 = arith.constant 2 : index
    %c0_37 = arith.constant 0 : index
    %c0_38 = arith.constant 0 : index
    %48 = vector.load %arg5[%c2_36, %c0_37, %c0_38] : memref<3x64x64xf32, #tpu.memory_space<vmem>>, vector<1x64x64xf32>
    %49 = vector.shape_cast %48 : vector<1x64x64xf32> to vector<64x64xf32>
    %50 = vector.broadcast %47 : f32 to vector<64x64xf32>
    %51 = arith.mulf %50, %49 : vector<64x64xf32>
    %52 = arith.addf %46, %51 : vector<64x64xf32>
    %53 = vector.extract_strided_slice %12 {offsets = [0, 32], sizes = [64, 32], strides = [1, 1]} : vector<64x64xf32> to vector<64x32xf32>
    %cst_39 = arith.constant dense<0.000000e+00> : vector<64x32xf32>
    %54 = tpu.matmul %52, %53, %cst_39 {dimension_numbers = #tpu.dot_dimension_numbers<[1], [0], [0], [1], [0, 0, 1, 1], [], []>} : vector<64x64xf32>, vector<64x32xf32>, vector<64x32xf32> -> vector<64x32xf32>
    %55 = arith.addf %35, %54 : vector<64x32xf32>
    %cst_40 = arith.constant 0.000000e+00 : f32
    %56 = vector.broadcast %cst_40 : f32 to vector<64x32xf32>
    %57 = arith.maximumf %55, %56 : vector<64x32xf32>
    %c1_41 = arith.constant 1 : index
    %c0_42 = arith.constant 0 : index
    %c0_43 = arith.constant 0 : index
    %58 = vector.load %arg6[%c1_41, %c0_42, %c0_43] : memref<2x32x64xf32, #tpu.memory_space<vmem>>, vector<1x32x64xf32>
    %59 = vector.shape_cast %58 : vector<1x32x64xf32> to vector<32x64xf32>
    %cst_44 = arith.constant dense<0.000000e+00> : vector<64x64xf32>
    %60 = tpu.matmul %57, %59, %cst_44 {dimension_numbers = #tpu.dot_dimension_numbers<[1], [0], [0], [1], [0, 0, 1, 1], [], []>} : vector<64x32xf32>, vector<32x64xf32>, vector<64x64xf32> -> vector<64x64xf32>
    %c1_45 = arith.constant 1 : index
    %c0_46 = arith.constant 0 : index
    %c0_47 = arith.constant 0 : index
    %61 = vector.load %arg7[%c1_45, %c0_46, %c0_47] : memref<2x1x32xf32, #tpu.memory_space<vmem>>, vector<1x1x32xf32>
    %62 = vector.shape_cast %61 : vector<1x1x32xf32> to vector<1x32xf32>
    %c6 = arith.constant 6 : index
    %63 = memref.load %arg0[%c6] : memref<12xf32, #tpu.memory_space<smem>>
    %c0_48 = arith.constant 0 : index
    %c0_49 = arith.constant 0 : index
    %c0_50 = arith.constant 0 : index
    %64 = vector.load %arg5[%c0_48, %c0_49, %c0_50] : memref<3x64x64xf32, #tpu.memory_space<vmem>>, vector<1x64x64xf32>
    %65 = vector.shape_cast %64 : vector<1x64x64xf32> to vector<64x64xf32>
    %66 = vector.broadcast %63 : f32 to vector<64x64xf32>
    %67 = arith.mulf %66, %65 : vector<64x64xf32>
    %c8 = arith.constant 8 : index
    %68 = memref.load %arg0[%c8] : memref<12xf32, #tpu.memory_space<smem>>
    %c1_51 = arith.constant 1 : index
    %c0_52 = arith.constant 0 : index
    %c0_53 = arith.constant 0 : index
    %69 = vector.load %arg5[%c1_51, %c0_52, %c0_53] : memref<3x64x64xf32, #tpu.memory_space<vmem>>, vector<1x64x64xf32>
    %70 = vector.shape_cast %69 : vector<1x64x64xf32> to vector<64x64xf32>
    %71 = vector.broadcast %68 : f32 to vector<64x64xf32>
    %72 = arith.mulf %71, %70 : vector<64x64xf32>
    %73 = arith.addf %67, %72 : vector<64x64xf32>
    %c10 = arith.constant 10 : index
    %74 = memref.load %arg0[%c10] : memref<12xf32, #tpu.memory_space<smem>>
    %c2_54 = arith.constant 2 : index
    %c0_55 = arith.constant 0 : index
    %c0_56 = arith.constant 0 : index
    %75 = vector.load %arg5[%c2_54, %c0_55, %c0_56] : memref<3x64x64xf32, #tpu.memory_space<vmem>>, vector<1x64x64xf32>
    %76 = vector.shape_cast %75 : vector<1x64x64xf32> to vector<64x64xf32>
    %77 = vector.broadcast %74 : f32 to vector<64x64xf32>
    %78 = arith.mulf %77, %76 : vector<64x64xf32>
    %79 = arith.addf %73, %78 : vector<64x64xf32>
    %80 = vector.extract_strided_slice %60 {offsets = [0, 0], sizes = [64, 32], strides = [1, 1]} : vector<64x64xf32> to vector<64x32xf32>
    %cst_57 = arith.constant dense<0.000000e+00> : vector<64x32xf32>
    %81 = tpu.matmul %79, %80, %cst_57 {dimension_numbers = #tpu.dot_dimension_numbers<[1], [0], [0], [1], [0, 0, 1, 1], [], []>} : vector<64x64xf32>, vector<64x32xf32>, vector<64x32xf32> -> vector<64x32xf32>
    %82 = vector.broadcast %62 : vector<1x32xf32> to vector<64x32xf32>
    %83 = arith.addf %82, %81 : vector<64x32xf32>
    %c7 = arith.constant 7 : index
    %84 = memref.load %arg0[%c7] : memref<12xf32, #tpu.memory_space<smem>>
    %c0_58 = arith.constant 0 : index
    %c0_59 = arith.constant 0 : index
    %c0_60 = arith.constant 0 : index
    %85 = vector.load %arg5[%c0_58, %c0_59, %c0_60] : memref<3x64x64xf32, #tpu.memory_space<vmem>>, vector<1x64x64xf32>
    %86 = vector.shape_cast %85 : vector<1x64x64xf32> to vector<64x64xf32>
    %87 = vector.broadcast %84 : f32 to vector<64x64xf32>
    %88 = arith.mulf %87, %86 : vector<64x64xf32>
    %c9 = arith.constant 9 : index
    %89 = memref.load %arg0[%c9] : memref<12xf32, #tpu.memory_space<smem>>
    %c1_61 = arith.constant 1 : index
    %c0_62 = arith.constant 0 : index
    %c0_63 = arith.constant 0 : index
    %90 = vector.load %arg5[%c1_61, %c0_62, %c0_63] : memref<3x64x64xf32, #tpu.memory_space<vmem>>, vector<1x64x64xf32>
    %91 = vector.shape_cast %90 : vector<1x64x64xf32> to vector<64x64xf32>
    %92 = vector.broadcast %89 : f32 to vector<64x64xf32>
    %93 = arith.mulf %92, %91 : vector<64x64xf32>
    %94 = arith.addf %88, %93 : vector<64x64xf32>
    %c11 = arith.constant 11 : index
    %95 = memref.load %arg0[%c11] : memref<12xf32, #tpu.memory_space<smem>>
    %c2_64 = arith.constant 2 : index
    %c0_65 = arith.constant 0 : index
    %c0_66 = arith.constant 0 : index
    %96 = vector.load %arg5[%c2_64, %c0_65, %c0_66] : memref<3x64x64xf32, #tpu.memory_space<vmem>>, vector<1x64x64xf32>
    %97 = vector.shape_cast %96 : vector<1x64x64xf32> to vector<64x64xf32>
    %98 = vector.broadcast %95 : f32 to vector<64x64xf32>
    %99 = arith.mulf %98, %97 : vector<64x64xf32>
    %100 = arith.addf %94, %99 : vector<64x64xf32>
    %101 = vector.extract_strided_slice %60 {offsets = [0, 32], sizes = [64, 32], strides = [1, 1]} : vector<64x64xf32> to vector<64x32xf32>
    %cst_67 = arith.constant dense<0.000000e+00> : vector<64x32xf32>
    %102 = tpu.matmul %100, %101, %cst_67 {dimension_numbers = #tpu.dot_dimension_numbers<[1], [0], [0], [1], [0, 0, 1, 1], [], []>} : vector<64x64xf32>, vector<64x32xf32>, vector<64x32xf32> -> vector<64x32xf32>
    %103 = arith.addf %83, %102 : vector<64x32xf32>
    %c0_68 = arith.constant 0 : index
    %c0_69 = arith.constant 0 : index
    %104 = vector.load %arg8[%c0_68, %c0_69] : memref<64x32xf32, #tpu.memory_space<vmem>>, vector<64x32xf32>
    tpu.vector_store %arg8[%c0_68, %c0_69], %103 {strides = array<i32>} : memref<64x32xf32, #tpu.memory_space<vmem>>, vector<64x32xf32>,
    return
  }
}

</mosaic_0001>

<bundles_post_ra>
// kernel: hetero_rgcn_forward.1
= control target key start
LH: loop header
LB: loop body
LE: loop exit
PB: predicated region body
PF: predicated region fallthrough
CT: control target
= control target key end

     0   :  { %13 = vsyncpa [#allocation4], 0  ;;  %s2408_s0 = inlined_call_operand.vmem [shape: f32[12], index: 0, kind: input, shape index: {}]   ;;  %s2409_s1 = inlined_call_operand.vmem [shape: f32[32,32], index: 1, kind: input, shape index: {}]   ;;  %s2410_s2 = inlined_call_operand.vmem [shape: f32[32,16], index: 2, kind: input, shape index: {}]   ;;  %s2411_s3 = inlined_call_operand.vmem [shape: f32[16,32], index: 3, kind: input, shape index: {}]   ;;  %s2412_s4 = inlined_call_operand.vmem [shape: f32[1,32], index: 4, kind: input, shape index: {}]   ;;  %s2413_s5 = inlined_call_operand.vmem [shape: f32[3,64,64], index: 5, kind: input, shape index: {}]   ;;  %s2414_s6 = inlined_call_operand.vmem [shape: f32[2,32,64], index: 6, kind: input, shape index: {}]   ;;  %s2415_s7 = inlined_call_operand.vmem [shape: f32[2,1,32], index: 7, kind: input, shape index: {}]   ;;  %s2416_s8 = inlined_call_operand.vmem [shape: f32[64,32], index: 8, kind: output, shape index: {}]  }
   0x1   :  { %s20_s29 = sshll.u32 %s2408_s0, 4  ;;  %s21_s29 = int_to_ptr.vmem [resolvable:$true] %s20_s29 }
   0x2   :  { %s1801_s30 = scalar_lea.vmem %s21_s29, 16  ;;  %p1806_p1 = scmp.lt.s32.totalorder %s21_s29, %s21_s29 }
   0x3   :  { %p1802_p0 = scmp.ne.s32.totalorder %s21_s29, %s1801_s30  ;;  %p1807_p2 = scmp.lt.s32.totalorder %s1801_s30, %s1801_s30 }
   0x5   :  { %p1808_p3 = por %p1807_p2, %p1806_p1 }
   0x7   :  { %p1809_p4 = pnand %p1808_p3, %p1802_p0 }
   0x9   :  { %1812 = shalt.err (!%p1809_p4)
}
   0xa   :  { %s1815_s9 = smov [#allocation3]  }
   0xb   :  { %23 = dma.vmem_to_smem %s21_s29, 16, %s1815_s9, [#allocation4]  }
   0xc   :  { %1813 = dma.done.wait [#allocation4], 16  }
   0xd   :  { %1814 = vsyncadd [#allocation4], 4294967280 }
   0xe   :  { %41 = sfence }
   0xf   :  { %v55_v0 = vld [vmem:[%s2411_s3] sm:$0xff]  ;;  %v56_v1 = vld [vmem:[%s2411_s3 + $0x8] sm:$0xff]  ;;  %vm64_vm0 = vcmask 130048   ;;  %v176_v6 = vld [vmem:[%s2414_s6 + $0x10] sm:$0xff]  ;;  %vm46_vm1 = vcmask 261120   ;;  %s1313_s14 = sld [smem:[#allocation3 + $0x2]] }
  0x10   :  { %v51_v2 = vld [vmem:[%s2410_s2] sm:$0xff]  ;;  %v1643_v3 = vpack.c.bf16 %v56_v1, %v55_v0  ;;  %v175_v5 = vld [vmem:[%s2414_s6 + $0x8] sm:$0xff]  ;;  %v177_v8 = vld [vmem:[%s2414_s6 + $0x18] sm:$0xff]  ;;  %s1322_s15 = sld [smem:[#allocation3 + $0x4]]  ;;  %vm380_vm2 = vcmask 523264   ;;  %s1340_s29 = sld [smem:[#allocation3 + $0x1]] }
  0x11   :  { %1485 = vmatprep.mubr.msk.f32.mxu0 %vm64_vm0, %v51_v2  ;;  %v174_v4 = vld [vmem:[%s2414_s6] sm:$0xff]  ;;  %v52_v9 = vld [vmem:[%s2410_s2 + $0x8] sm:$0xff]  ;;  %v53_v10 = vld [vmem:[%s2410_s2 + $0x10] sm:$0xff]  ;;  %v1651_v11 = vpack.c.bf16 %v177_v8, %v176_v6  ;;  %s1341_s30 = sld [smem:[#allocation3 + $0x3]]  ;;  %s1342_s0 = sld [smem:[#allocation3 + $0x5]] }
  0x12   :  { %1644 = vmatprep.subr.bf16.mxu0 %v1643_v3  ;;  %v1647_v7 = vpack.c.bf16 %v175_v5, %v174_v4  ;;  %v54_v12 = vld [vmem:[%s2410_s2 + $0x18] sm:$0xff]  ;;  %v42_v13 = vld [vmem:[%s2409_s1] sm:$0xff]  ;;  %v43_v14 = vld [vmem:[%s2409_s1 + $0x8] sm:$0xff]  ;;  %s1365_s23 = sld [smem:[#allocation3 + $0x8]]  ;;  %s1366_s24 = sld [smem:[#allocation3 + $0xa]] }
  0x13   :  { %1646 = vmatpush3.bf16.msra.mxu0 %v1643_v3  ;;  %47 = vst.msk [vmem:[#allocation2] sm:$0xff] %vm46_vm1, %v42_v13  ;;  %48 = vst.msk [vmem:[#allocation2 + $0x8] sm:$0xff] %vm46_vm1, %v43_v14  ;;  %v44_v15 = vld [vmem:[%s2409_s1 + $0x10] sm:$0xff]  ;;  %v45_v16 = vld [vmem:[%s2409_s1 + $0x18] sm:$0xff]  ;;  %s1816_s1 = smov 96   ;;  %s1376_s25 = sld [smem:[#allocation3 + $0x7]] }
  0x14   :  { %1648 = vmatprep.subr.bf16.mxu0 %v1647_v7  ;;  %49 = vst.msk [vmem:[#allocation2 + $0x10] sm:$0xff] %vm46_vm1, %v44_v15  ;;  %50 = vst.msk [vmem:[#allocation2 + $0x18] sm:$0xff] %vm46_vm1, %v45_v16  ;;  %v1300_v21 = vld [vmem:[%s2412_s4] ss:$0 sm:$0xff]  ;;  %s308_s4 = sld [smem:[#allocation3]]  ;;  %v1963_v54 = vld [vmem:[%s2413_s5 + $0x8] sm:$0xff] }
  0x15   :  { %v1935_v42 = vld [vmem:[%s2413_s5] sm:$0xff]  ;;  %v1949_v46 = vstv %s1313_s14  ;;  %v1968_v55 = vld [vmem:[%s2413_s5 + $0x48] sm:$0xff]  ;;  %v1977_v58 = vld [vmem:[%s2413_s5 + $0x10] sm:$0xff]  ;;  %s1377_s26 = sld [smem:[#allocation3 + $0x9]]  ;;  %s1378_s27 = sld [smem:[#allocation3 + $0xb]] }
  0x16   :  { %1486 = vmatmul.mubr.msk.f32.vlgmr.msra.gmra.mrb[0].mxu0 %vm64_vm0, %v52_v9  ;;  %v1940_v43 = vld [vmem:[%s2413_s5 + $0x40] sm:$0xff]  ;;  %v1955_v49 = vstv %s1322_s15  ;;  %v338_v57 = vmul.f32 %v1968_v55, %v1949_v46  ;;  %v1982_v59 = vld [vmem:[%s2413_s5 + $0x50] sm:$0xff]  ;;  %v1987_v60 = vld [vmem:[%s2413_s5 + $0x88] sm:$0xff] }
  0x17   :  { %1488 = vmatprep.mubr.msk.f32.mxu0 %vm64_vm0, %v53_v10  ;;  %1650 = vmatpush3.bf16.msra.mxu0 %v1647_v7  ;;  %v1945_v44 = vld [vmem:[%s2413_s5 + $0x80] sm:$0xff]  ;;  %v337_v48 = vmul.f32 %v1940_v43, %v1949_v46  ;;  %v1992_v62 = vld [vmem:[%s2413_s5 + $0x18] sm:$0xff]  ;;  %v339_v1 = vmul.f32 %v1982_v59, %v1949_v46  ;;  %v365_v5 = vmul.f32 %v1987_v60, %v1955_v49  ;;  %v2008_v6 = vld [vmem:[%s2413_s5 + $0x90] sm:$0xff] }
  0x18   :  { %1652 = vmatprep.subr.bf16.mxu0 %v1651_v11  ;;  %v364_v50 = vmul.f32 %v1945_v44, %v1955_v49  ;;  %v1997_v63 = vld [vmem:[%s2413_s5 + $0x58] sm:$0xff]  ;;  %v366_v14 = vmul.f32 %v2008_v6, %v1955_v49  ;;  %v2023_v15 = vld [vmem:[%s2413_s5 + $0x20] sm:$0xff] }
  0x19   :  { %v340_v10 = vmul.f32 %v1997_v63, %v1949_v46  ;;  %v2028_v16 = vld [vmem:[%s2413_s5 + $0x60] sm:$0xff] }
  0x1a   :  { %1489 = vmatmul.mubr.msk.f32.gmra.mrb[2].mxu0 %vm64_vm0, %v54_v12  ;;  %v166_v17 = vld [vmem:[#allocation2] sm:$0xff]  ;;  %v167_v18 = vld [vmem:[#allocation2 + $0x8] sm:$0xff]  ;;  %v1947_v45 = vstv %s308_s4  ;;  %v2016_v12 = vstv %s1341_s30 }
  0x1b   :  { %1654 = vmatpush3.bf16.msra.mxu0 %v1651_v11  ;;  %1499 = vmatprep.mubr.msk.f32.mxu0 %vm46_vm1, %v166_v17  ;;  %v168_v19 = vld [vmem:[#allocation2 + $0x10] sm:$0xff]  ;;  %v169_v20 = vld [vmem:[#allocation2 + $0x18] sm:$0xff]  ;;  %v318_v47 = vmul.f32 %v1947_v45, %v1935_v42  ;;  %v319_v56 = vmul.f32 %v1947_v45, %v1963_v54  ;;  %v320_v0 = vmul.f32 %v1947_v45, %v1977_v58  ;;  %v2014_v11 = vstv %s1340_s29 }
  0x1c   :  { %v321_v9 = vmul.f32 %v1947_v45, %v1992_v62  ;;  %v2033_v17 = vld [vmem:[%s2413_s5 + $0x98] sm:$0xff] }
  0x1d   :  { %v345_v51 = vadd.f32 %v337_v48, %v318_v47  ;;  %v346_v4 = vadd.f32 %v338_v57, %v319_v56  ;;  %v347_v13 = vadd.f32 %v339_v1, %v320_v0  ;;  %v2082_v48 = vld [vmem:[%s2413_s5 + $0xa0] sm:$0xff]  ;;  %v2094_v0 = vld [vmem:[%s2413_s5 + $0x30] sm:$0xff] }
  0x1e   :  { %1500 = vmatmul.mubr.msk.f32.vlgmr.msra.gmra.mrb[4].mxu0 %vm46_vm1, %v167_v18  ;;  %v2035_v18 = vstv %s1342_s0  ;;  %v2099_v1 = vld [vmem:[%s2413_s5 + $0x70] sm:$0xff] }
  0x1f   :  { %1502 = vmatprep.mubr.msk.f32.mxu0 %vm46_vm1, %v168_v19  ;;  %v372_v52 = vadd.f32 %v364_v50, %v345_v51  ;;  %v527_v19 = vmul.f32 %v2014_v11, %v1963_v54  ;;  %v556_v51 = vmul.f32 %v2008_v6, %v2035_v18  ;;  %v557_v57 = vmul.f32 %v2033_v17, %v2035_v18 }
  0x22   :  { %1503 = vmatmul.mubr.msk.f32.gmra.mrb[6].mxu0 %vm46_vm1, %v169_v20  ;;  %v537_v20 = vmul.f32 %v1968_v55, %v2016_v12 }
  0xe9   :  { %v1487_v22 = vpop.f32.mrb[0].mxu0 }
  0xea   :  { %v149_v23 = vadd.f32 %v1487_v22, %v1300_v21  ;;  %v143_v24 = vpop.f32.mrb[1].mxu0 }
  0xeb   :  { %v144_v25 = vadd.f32 %v1300_v21, %v143_v24  ;;  %v348_v24 = vadd.f32 %v340_v10, %v321_v9 }
  0xec   :  { %163 = vst.msk [vmem:[#allocation2 + $0x28] sm:$0xff] %vm46_vm1, %v149_v23  ;;  %v2045_v23 = vadd.f32 %v365_v5, %v346_v4  ;;  %v540_v4 = vmul.f32 %v2028_v16, %v2016_v12 }
  0xed   :  { %162 = vst.msk [vmem:[#allocation2 + $0x20] sm:$0xff] %vm46_vm1, %v144_v25  ;;  %v1490_v26 = vpop.f32.mrb[2].mxu0  ;;  %v2050_v25 = vld [vmem:[%s2413_s5 + $0x28] sm:$0xff] }
  0xee   :  { %v159_v27 = vadd.f32 %v1490_v26, %v1300_v21  ;;  %v153_v28 = vpop.f32.mrb[3].mxu0  ;;  %v322_v26 = vmul.f32 %v1947_v45, %v2023_v15  ;;  %v531_v9 = vmul.f32 %v2014_v11, %v2050_v25 }
  0xef   :  { %v154_v29 = vadd.f32 %v1300_v21, %v153_v28  ;;  %v545_v28 = vadd.f32 %v537_v20, %v527_v19  ;;  %v2118_v19 = vld [vmem:[%s2413_s5 + $0xa8] sm:$0xff] }
  0xf0   :  { %165 = vst.msk [vmem:[#allocation2 + $0x38] sm:$0xff] %vm46_vm1, %v159_v27  ;;  %v341_v27 = vmul.f32 %v2028_v16, %v1949_v46 }
  0xf1   :  { %164 = vst.msk [vmem:[#allocation2 + $0x30] sm:$0xff] %vm46_vm1, %v154_v29  ;;  %v1501_v34 = vpop.f32.mrb[4].mxu0  ;;  %v555_v29 = vmul.f32 %v1987_v60, %v2035_v18 }
  0xf2   :  { %v268_v35 = vpop.f32.mrb[5].mxu0 }
  0xf3   :  { %v171_v31 = vld [vmem:[#allocation2 + $0x28] sm:$0xff]  ;;  %v1655_v36 = vpack.c.bf16 %v1501_v34, %v268_v35  ;;  %v1761_v37 = vpack.i.bf16 %v1501_v34, %v268_v35  ;;  %v528_v34 = vmul.f32 %v2014_v11, %v1977_v58  ;;  %v538_v35 = vmul.f32 %v1982_v59, %v2016_v12 }
  0xf4   :  { %v170_v30 = vld [vmem:[#allocation2 + $0x20] sm:$0xff] }
  0xf5   :  { %1505 = vmatprep.mubr.msk.f32.mxu0 %vm46_vm1, %v170_v30  ;;  %1762 = vrot.lane.b32.xlu0 %v1761_v37, %s1816_s1  ;;  %v1504_v38 = vpop.f32.mrb[6].mxu0  ;;  %v323_v37 = vmul.f32 %v1947_v45, %v2050_v25  ;;  %v546_v50 = vadd.f32 %v538_v35, %v528_v34  ;;  %v2132_v34 = vld [vmem:[%s2413_s5 + $0x38] sm:$0xff] }
  0xf6   :  { %1506 = vmatmul.mubr.msk.f32.gmra.mrb[8].mxu0 %vm46_vm1, %v171_v31  ;;  %1656 = vmatprep.subr.bf16.mxu0 %v1655_v36  ;;  %v278_v39 = vpop.f32.mrb[7].mxu0  ;;  %v2058_v31 = vadd.f32 %v366_v14, %v347_v13  ;;  %v2137_v35 = vld [vmem:[%s2413_s5 + $0x78] sm:$0xff] }
  0xf7   :  { %v173_v33 = vld [vmem:[#allocation2 + $0x38] sm:$0xff]  ;;  %1658 = vmatpush3.bf16.msra.mxu0 %v1655_v36  ;;  %v1766_v40 = vpack.i.bf16 %v1504_v38, %v278_v39  ;;  %v1659_v41 = vpack.c.bf16 %v1504_v38, %v278_v39  ;;  %v2073_v38 = vadd.f32 %v555_v29, %v545_v28  ;;  %v529_v39 = vmul.f32 %v2014_v11, %v1992_v62 }
  0xf8   :  { %v172_v32 = vld [vmem:[#allocation2 + $0x30] sm:$0xff]  ;;  %v343_v28 = vmul.f32 %v2099_v1, %v1949_v46 }
  0xf9   :  { %1508 = vmatprep.mubr.msk.f32.mxu0 %vm46_vm1, %v172_v32  ;;  %1767 = vrot.lane.b32.xlu0 %v1766_v40, %s1816_s1  ;;  %v367_v32 = vmul.f32 %v2033_v17, %v1955_v49  ;;  %v539_v40 = vmul.f32 %v1997_v63, %v2016_v12 }
  0xfa   :  { %1509 = vmatmul.mubr.msk.f32.gmra.mrb[10].mxu0 %vm46_vm1, %v173_v33  ;;  %1660 = vmatprep.subr.bf16.mxu0 %v1659_v41  ;;  %v2065_v33 = vld [vmem:[%s2413_s5 + $0x68] sm:$0xff] }
  0xfb   :  { %1662 = vmatpush3.bf16.msra.mxu0 %v1659_v41  ;;  %1527 = vmatprep.mubr.msk.f32.mxu0 %vm380_vm2, %v372_v52  ;;  %v349_v52 = vadd.f32 %v341_v27, %v322_v26  ;;  %v547_v56 = vadd.f32 %v539_v40, %v529_v39  ;;  %v541_v10 = vmul.f32 %v2065_v33, %v2016_v12 }
  0xfc   :  { %v558_v26 = vmul.f32 %v2082_v48, %v2035_v18  ;;  %v324_v27 = vmul.f32 %v1947_v45, %v2094_v0  ;;  %v532_v39 = vmul.f32 %v2014_v11, %v2094_v0  ;;  %v542_v40 = vmul.f32 %v2099_v1, %v2016_v12 }
  0xfd   :  { %v549_v29 = vadd.f32 %v541_v10, %v531_v9 }
 0x167   :  { %v1763_v53 = vpop.permute.xlu0 %1762 }
 0x168   :  { %v1765_v2 = vunpack.i.h.bf16 %v1763_v53  ;;  %v1764_v3 = vunpack.i.l.bf16 %v1763_v53  ;;  %v342_v53 = vmul.f32 %v2065_v33, %v1949_v46 }
 0x16a   :  { %v2041_v21 = vpack.c.bf16 %v1765_v2, %v1764_v3  ;;  %v2101_v2 = vadd.f32 %v556_v51, %v546_v50  ;;  %v530_v3 = vmul.f32 %v2014_v11, %v2023_v15  ;;  %v533_v51 = vmul.f32 %v2014_v11, %v2132_v34 }
 0x16b   :  { %v1768_v61 = vpop.permute.xlu0 %1767 }
 0x16c   :  { %v1770_v7 = vunpack.i.h.bf16 %v1768_v61  ;;  %v1769_v8 = vunpack.i.l.bf16 %v1768_v61  ;;  %v548_v20 = vadd.f32 %v540_v4, %v530_v3 }
 0x16e   :  { %v2043_v22 = vpack.c.bf16 %v1770_v7, %v1769_v8  ;;  %v368_v7 = vmul.f32 %v2082_v48, %v1955_v49  ;;  %v2109_v8 = vadd.f32 %v557_v57, %v547_v56  ;;  %v543_v56 = vmul.f32 %v2137_v35, %v2016_v12 }
 0x16f   :  { %v350_v57 = vadd.f32 %v342_v53, %v323_v37  ;;  %v351_v53 = vadd.f32 %v343_v28, %v324_v27  ;;  %v554_v27 = vmul.f32 %v1945_v44, %v2035_v18 }
 0x170   :  { %v376_v4 = vadd.f32 %v368_v7, %v349_v52  ;;  %v551_v9 = vadd.f32 %v543_v56, %v533_v51  ;;  %v536_v52 = vmul.f32 %v1940_v43, %v2016_v12  ;;  %v1351_v7 = vld [vmem:[%s2414_s6 + $0x20] sm:$0xff]  ;;  %v1353_v56 = vld [vmem:[%s2414_s6 + $0x30] sm:$0xff] }
 0x1c9   :  { %v1507_v30 = vpop.f32.mrb[8].mxu0 }
 0x1ca   :  { %v288_v36 = vpop.f32.mrb[9].mxu0 }
 0x1cb   :  { %v1663_v41 = vpack.c.bf16 %v1507_v30, %v288_v36  ;;  %v1771_v47 = vpack.i.bf16 %v1507_v30, %v288_v36  ;;  %v559_v30 = vmul.f32 %v2118_v19, %v2035_v18  ;;  %v2139_v36 = vadd.f32 %v558_v26, %v548_v20 }
 0x1cd   :  { %1772 = vrot.lane.b32.xlu1 %v1771_v47, %s1816_s1  ;;  %v1510_v61 = vpop.f32.mrb[10].mxu0  ;;  %1664 = vmatprep.subr.bf16.mxu0 %v1663_v41  ;;  %v2148_v47 = vld [vmem:[%s2413_s5 + $0xb0] sm:$0xff]  ;;  %v567_v50 = vadd.f32 %v559_v30, %v549_v29 }
 0x1ce   :  { %v298_v5 = vpop.f32.mrb[11].mxu0  ;;  %1666 = vmatpush3.bf16.msra.mxu0 %v1663_v41  ;;  %v375_v41 = vadd.f32 %v367_v32, %v348_v24  ;;  %v2160_v24 = vld [vmem:[%s2413_s5 + $0xb8] sm:$0xff]  ;;  %v550_v32 = vadd.f32 %v542_v40, %v532_v39  ;;  %v560_v3 = vmul.f32 %v2148_v47, %v2035_v18  ;;  %v370_v10 = vmul.f32 %v2148_v47, %v1955_v49 }
 0x1cf   :  { %v1776_v13 = vpack.i.bf16 %v1510_v61, %v298_v5  ;;  %v1667_v14 = vpack.c.bf16 %v1510_v61, %v298_v5  ;;  %v369_v61 = vmul.f32 %v2118_v19, %v1955_v49  ;;  %v325_v5 = vmul.f32 %v1947_v45, %v2132_v34 }
 0x1d0   :  { %v561_v37 = vmul.f32 %v2160_v24, %v2035_v18  ;;  %v526_v45 = vmul.f32 %v2014_v11, %v1935_v42  ;;  %v371_v11 = vmul.f32 %v2160_v24, %v1955_v49  ;;  %v378_v12 = vadd.f32 %v370_v10, %v351_v53 }
 0x1d1   :  { %1777 = vrot.lane.b32.xlu1 %v1776_v13, %s1816_s1  ;;  %1668 = vmatprep.subr.bf16.mxu0 %v1667_v14  ;;  %v344_v13 = vmul.f32 %v2137_v35, %v1949_v46  ;;  %v1352_v46 = vld [vmem:[%s2414_s6 + $0x28] sm:$0xff] }
 0x1d2   :  { %1670 = vmatpush3.bf16.msra.mxu0 %v1667_v14  ;;  %v568_v14 = vadd.f32 %v560_v3, %v550_v32  ;;  %v1687_v20 = vpack.c.bf16 %v1352_v46, %v1351_v7  ;;  %v544_v26 = vadd.f32 %v536_v52, %v526_v45 }
 0x1d3   :  { %1672 = vmatprep.subr.bf16.mxu0 %v2041_v21 }
 0x1d4   :  { %1688 = vmatprep.subr.bf16.mxu1 %v1687_v20  ;;  %v562_v29 = vadd.f32 %v554_v27, %v544_v26  ;;  %v2229_v27 = vstv %s1365_s23 }
 0x1d5   :  { %1528 = vmatmul.mubr.msk.f32.vlgmr.msra.gmra.mrb[12].mxu0 %vm380_vm2, %v2045_v23  ;;  %v569_v23 = vadd.f32 %v561_v37, %v551_v9  ;;  %1690 = vmatpush3.bf16.msra.mxu1 %v1687_v20 }
 0x1d6   :  { %1674 = vmatpush3.bf16.msra.mxu0 %v2041_v21  ;;  %1530 = vmatprep.mubr.msk.f32.mxu0 %vm380_vm2, %v2058_v31  ;;  %v377_v21 = vadd.f32 %v369_v61, %v350_v57  ;;  %v352_v31 = vadd.f32 %v344_v13, %v325_v5 }
 0x1d7   :  { %1676 = vmatprep.subr.bf16.mxu0 %v2043_v22 }
 0x1d8   :  { %v379_v28 = vadd.f32 %v371_v11, %v352_v31 }
 0x1d9   :  { %1531 = vmatmul.mubr.msk.f32.gmra.mrb[14].mxu0 %vm380_vm2, %v375_v41 }
 0x1da   :  { %1678 = vmatpush3.bf16.msra.mxu0 %v2043_v22  ;;  %1533 = vmatprep.mubr.msk.f32.mxu0 %vm380_vm2, %v376_v4 }
 0x1dd   :  { %1534 = vmatmul.mubr.msk.f32.gmra.mrb[16].mxu0 %vm380_vm2, %v377_v21 }
 0x1de   :  { %1536 = vmatprep.mubr.msk.f32.mxu0 %vm380_vm2, %v378_v12 }
 0x1e1   :  { %1537 = vmatmul.mubr.msk.f32.gmra.mrb[18].mxu0 %vm380_vm2, %v379_v28 }
 0x1e2   :  { %1555 = vmatprep.mubr.msk.f32.mxu0 %vm380_vm2, %v562_v29  ;;  %v895_v29 = vmul.f32 %v1940_v43, %v2229_v27 }
 0x23f   :  { %v1773_v49 = vpop.permute.xlu1 %1772 }
 0x240   :  { %v1775_v22 = vunpack.i.h.bf16 %v1773_v49  ;;  %v1774_v30 = vunpack.i.l.bf16 %v1773_v49  ;;  %v2235_v49 = vstv %s1366_s24 }
 0x242   :  { %v1679_v39 = vpack.c.bf16 %v1775_v22, %v1774_v30  ;;  %v913_v30 = vmul.f32 %v1945_v44, %v2235_v49 }
 0x243   :  { %v1778_v40 = vpop.permute.xlu1 %1777 }
 0x244   :  { %v1780_v41 = vunpack.i.h.bf16 %v1778_v40  ;;  %v1779_v51 = vunpack.i.l.bf16 %v1778_v40  ;;  %1680 = vmatprep.subr.bf16.mxu0 %v1679_v39 }
 0x245   :  { %1682 = vmatpush3.bf16.msra.mxu0 %v1679_v39 }
 0x246   :  { %v1683_v18 = vpack.c.bf16 %v1780_v41, %v1779_v51  ;;  %v896_v41 = vmul.f32 %v1968_v55, %v2229_v27 }
 0x248   :  { %1684 = vmatprep.subr.bf16.mxu0 %v1683_v18 }
 0x249   :  { %1686 = vmatpush3.bf16.msra.mxu0 %v1683_v18 }
 0x24c   :  { %1556 = vmatmul.mubr.msk.f32.vlgmr.msra.gmra.mrb[12].mxu0 %vm380_vm2, %v2073_v38  ;;  %v1354_v38 = vld [vmem:[%s2414_s6 + $0x38] sm:$0xff]  ;;  %s1364_s6 = sld [smem:[#allocation3 + $0x6]] }
 0x24d   :  { %1558 = vmatprep.mubr.msk.f32.mxu0 %vm380_vm2, %v2101_v2  ;;  %v1691_v2 = vpack.c.bf16 %v1354_v38, %v1353_v56  ;;  %v914_v56 = vmul.f32 %v1987_v60, %v2235_v49 }
 0x24f   :  { %1692 = vmatprep.subr.bf16.mxu1 %v1691_v2 }
 0x250   :  { %1559 = vmatmul.mubr.msk.f32.gmra.mrb[14].mxu0 %vm380_vm2, %v2109_v8  ;;  %1694 = vmatpush3.bf16.msra.mxu1 %v1691_v2  ;;  %v1339_v8 = vld [vmem:[%s2415_s7] ss:$0 sm:$0xff] }
 0x251   :  { %1561 = vmatprep.mubr.msk.f32.mxu0 %vm380_vm2, %v2139_v36 }
 0x252   :  { %v2227_v26 = vstv %s1364_s6 }
 0x253   :  { %v885_v28 = vmul.f32 %v2227_v26, %v1935_v42  ;;  %v886_v40 = vmul.f32 %v2227_v26, %v1963_v54  ;;  %v887_v2 = vmul.f32 %v2227_v26, %v1977_v58 }
 0x254   :  { %1562 = vmatmul.mubr.msk.f32.gmra.mrb[16].mxu0 %vm380_vm2, %v567_v50 }
 0x255   :  { %1564 = vmatprep.mubr.msk.f32.mxu0 %vm380_vm2, %v568_v14  ;;  %v903_v22 = vadd.f32 %v895_v29, %v885_v28  ;;  %v904_v18 = vadd.f32 %v896_v41, %v886_v40  ;;  %v890_v28 = vmul.f32 %v2227_v26, %v2050_v25  ;;  %v900_v41 = vmul.f32 %v2065_v33, %v2229_v27 }
 0x257   :  { %v921_v39 = vadd.f32 %v913_v30, %v903_v22 }
 0x258   :  { %1565 = vmatmul.mubr.msk.f32.gmra.mrb[18].mxu0 %vm380_vm2, %v569_v23 }
 0x31f   :  { %v1557_v36 = vpop.f32.mrb[12].mxu0 }
 0x320   :  { %v1727_v50 = vadd.f32 %v1557_v36, %v1339_v8  ;;  %v692_v57 = vpop.f32.mrb[13].mxu0 }
 0x321   :  { %v1728_v61 = vadd.f32 %v1339_v8, %v692_v57  ;;  %v888_v57 = vmul.f32 %v2227_v26, %v1992_v62 }
 0x322   :  { %v740_v4 = vmax.f32 %v1727_v50, 0.0 }
 0x323   :  { %v739_v32 = vmax.f32 %v1728_v61, 0.0  ;;  %v1560_v3 = vpop.f32.mrb[14].mxu0  ;;  %v898_v61 = vmul.f32 %v1997_v63, %v2229_v27 }
 0x324   :  { %v1729_v5 = vadd.f32 %v1560_v3, %v1339_v8  ;;  %v702_v9 = vpop.f32.mrb[15].mxu0  ;;  %v2256_v3 = vstv %s1377_s26 }
 0x325   :  { %v1730_v37 = vadd.f32 %v1339_v8, %v702_v9  ;;  %1575 = vmatprep.mubr.msk.f32.mxu1 %vm46_vm1, %v739_v32  ;;  %v2254_v32 = vstv %s1376_s25  ;;  %v1087_v22 = vmul.f32 %v1997_v63, %v2256_v3 }
 0x326   :  { %1576 = vmatmul.mubr.msk.f32.vlgmr.msra.gmra.mrb[0].mxu1 %vm46_vm1, %v740_v4  ;;  %v742_v13 = vmax.f32 %v1729_v5, 0.0  ;;  %v2259_v5 = vadd.f32 %v914_v56, %v904_v18  ;;  %v1078_v63 = vmul.f32 %v2254_v32, %v2023_v15 }
 0x327   :  { %v741_v53 = vmax.f32 %v1730_v37, 0.0  ;;  %v1563_v10 = vpop.f32.mrb[16].mxu0 }
 0x328   :  { %v1731_v14 = vadd.f32 %v1563_v10, %v1339_v8  ;;  %v712_v45 = vpop.f32.mrb[17].mxu0  ;;  %v1075_v10 = vmul.f32 %v2254_v32, %v1963_v54 }
 0x329   :  { %v1732_v52 = vadd.f32 %v1339_v8, %v712_v45  ;;  %1578 = vmatprep.mubr.msk.f32.mxu1 %vm46_vm1, %v741_v53  ;;  %v2261_v53 = vstv %s1378_s27 }
 0x32a   :  { %1579 = vmatmul.mubr.msk.f32.gmra.mrb[2].mxu1 %vm46_vm1, %v742_v13  ;;  %v744_v46 = vmax.f32 %v1731_v14, 0.0  ;;  %v1085_v13 = vmul.f32 %v1968_v55, %v2256_v3  ;;  %v916_v55 = vmul.f32 %v2033_v17, %v2235_v49  ;;  %v1105_v18 = vmul.f32 %v2033_v17, %v2261_v53 }
 0x32b   :  { %v743_v23 = vmax.f32 %v1732_v52, 0.0  ;;  %v1566_v7 = vpop.f32.mrb[18].mxu0  ;;  %v915_v52 = vmul.f32 %v2008_v6, %v2235_v49  ;;  %v1079_v17 = vmul.f32 %v2254_v32, %v2050_v25 }
 0x32c   :  { %v1733_v21 = vadd.f32 %v1566_v7, %v1339_v8  ;;  %v722_v31 = vpop.f32.mrb[19].mxu0  ;;  %v889_v7 = vmul.f32 %v2227_v26, %v2023_v15  ;;  %v1106_v15 = vmul.f32 %v2082_v48, %v2261_v53 }
 0x32d   :  { %v1734_v11 = vadd.f32 %v1339_v8, %v722_v31  ;;  %1581 = vmatprep.mubr.msk.f32.mxu1 %vm46_vm1, %v743_v23  ;;  %v897_v8 = vmul.f32 %v1982_v59, %v2229_v27  ;;  %v906_v23 = vadd.f32 %v898_v61, %v888_v57  ;;  %v1103_v31 = vmul.f32 %v1987_v60, %v2261_v53 }
 0x32e   :  { %1582 = vmatmul.mubr.msk.f32.gmra.mrb[4].mxu1 %vm46_vm1, %v744_v46  ;;  %v746_v12 = vmax.f32 %v1733_v21, 0.0  ;;  %v899_v46 = vmul.f32 %v2028_v16, %v2229_v27  ;;  %v1093_v21 = vadd.f32 %v1085_v13, %v1075_v10  ;;  %v1077_v60 = vmul.f32 %v2254_v32, %v1992_v62 }
 0x32f   :  { %v745_v20 = vmax.f32 %v1734_v11, 0.0  ;;  %v905_v37 = vadd.f32 %v897_v8, %v887_v2  ;;  %v1076_v11 = vmul.f32 %v2254_v32, %v1977_v58  ;;  %v1104_v58 = vmul.f32 %v2008_v6, %v2261_v53 }
 0x330   :  { %v2284_v29 = vadd.f32 %v1103_v31, %v1093_v21  ;;  %v1088_v6 = vmul.f32 %v2028_v16, %v2256_v3  ;;  %v917_v2 = vmul.f32 %v2082_v48, %v2235_v49  ;;  %v891_v16 = vmul.f32 %v2227_v26, %v2094_v0 }
 0x331   :  { %1584 = vmatprep.mubr.msk.f32.mxu1 %vm46_vm1, %v745_v20  ;;  %v1086_v20 = vmul.f32 %v1982_v59, %v2256_v3  ;;  %v907_v59 = vadd.f32 %v899_v46, %v889_v7  ;;  %v1107_v10 = vmul.f32 %v2118_v19, %v2261_v53  ;;  %v1090_v48 = vmul.f32 %v2099_v1, %v2256_v3 }
 0x332   :  { %1585 = vmatmul.mubr.msk.f32.gmra.mrb[6].mxu1 %vm46_vm1, %v746_v12  ;;  %v1096_v61 = vadd.f32 %v1088_v6, %v1078_v63  ;;  %v923_v13 = vadd.f32 %v915_v52, %v905_v37  ;;  %v1091_v7 = vmul.f32 %v2137_v35, %v2256_v3  ;;  %v924_v46 = vadd.f32 %v916_v55, %v906_v23 }
 0x333   :  { %1603 = vmatprep.mubr.msk.f32.mxu1 %vm380_vm2, %v921_v39  ;;  %v1094_v40 = vadd.f32 %v1086_v20, %v1076_v11  ;;  %v908_v21 = vadd.f32 %v900_v41, %v890_v28  ;;  %v1109_v37 = vmul.f32 %v2160_v24, %v2261_v53  ;;  %v892_v23 = vmul.f32 %v2227_v26, %v2132_v34 }
 0x334   :  { %v2320_v25 = vadd.f32 %v1106_v15, %v1096_v61  ;;  %v902_v55 = vmul.f32 %v2137_v35, %v2229_v27  ;;  %v1084_v28 = vmul.f32 %v1940_v43, %v2256_v3  ;;  %v920_v35 = vmul.f32 %v2160_v24, %v2235_v49 }
 0x335   :  { %v2297_v56 = vadd.f32 %v1104_v58, %v1094_v40 }
 0x3f9   :  { %v1577_v51 = vpop.f32.mrb[0].mxu1 }
 0x3fa   :  { %v842_v38 = vpop.f32.mrb[1].mxu1 }
 0x3fb   :  { %v1781_v36 = vpack.i.bf16 %v1577_v51, %v842_v38  ;;  %v1695_v50 = vpack.c.bf16 %v1577_v51, %v842_v38  ;;  %v1095_v51 = vadd.f32 %v1087_v22, %v1077_v60 }
 0x3fd   :  { %1782 = vrot.lane.b32.xlu0 %v1781_v36, %s1816_s1  ;;  %v1580_v4 = vpop.f32.mrb[2].mxu1  ;;  %1696 = vmatprep.subr.bf16.mxu1 %v1695_v50  ;;  %v2305_v8 = vadd.f32 %v1105_v18, %v1095_v51  ;;  %v1089_v36 = vmul.f32 %v2065_v33, %v2256_v3  ;;  %v1080_v33 = vmul.f32 %v2254_v32, %v2094_v0 }
 0x3fe   :  { %v852_v9 = vpop.f32.mrb[3].mxu1  ;;  %1698 = vmatpush3.bf16.msra.mxu1 %v1695_v50  ;;  %v925_v0 = vadd.f32 %v917_v2, %v907_v59 }
 0x3ff   :  { %v1786_v14 = vpack.i.bf16 %v1580_v4, %v852_v9  ;;  %v1699_v45 = vpack.c.bf16 %v1580_v4, %v852_v9  ;;  %v901_v4 = vmul.f32 %v2099_v1, %v2229_v27  ;;  %v1097_v9 = vadd.f32 %v1089_v36, %v1079_v17 }
 0x400   :  { %v1098_v31 = vadd.f32 %v1090_v48, %v1080_v33  ;;  %v918_v1 = vmul.f32 %v2118_v19, %v2235_v49  ;;  %v919_v19 = vmul.f32 %v2148_v47, %v2235_v49 }
 0x401   :  { %1787 = vrot.lane.b32.xlu1 %v1786_v14, %s1816_s1  ;;  %v1583_v54 = vpop.f32.mrb[4].mxu1  ;;  %1700 = vmatprep.subr.bf16.mxu1 %v1699_v45  ;;  %v2326_v14 = vadd.f32 %v1107_v10, %v1097_v9  ;;  %v909_v52 = vadd.f32 %v901_v4, %v891_v16 }
 0x402   :  { %v862_v12 = vpop.f32.mrb[5].mxu1  ;;  %1702 = vmatpush3.bf16.msra.mxu1 %v1699_v45  ;;  %v1081_v45 = vmul.f32 %v2254_v32, %v2132_v34  ;;  %v926_v60 = vadd.f32 %v918_v1, %v908_v21  ;;  %v910_v34 = vadd.f32 %v902_v55, %v892_v23 }
 0x403   :  { %v1791_v30 = vpack.i.bf16 %v1583_v54, %v862_v12  ;;  %v1703_v39 = vpack.c.bf16 %v1583_v54, %v862_v12  ;;  %v1108_v54 = vmul.f32 %v2148_v47, %v2261_v53  ;;  %v1074_v12 = vmul.f32 %v2254_v32, %v1935_v42 }
 0x404   :  { %v1099_v11 = vadd.f32 %v1091_v7, %v1081_v45  ;;  %v927_v26 = vadd.f32 %v919_v19, %v909_v52  ;;  %v1102_v47 = vmul.f32 %v1945_v44, %v2261_v53  ;;  %v928_v42 = vadd.f32 %v920_v35, %v910_v34 }
 0x405   :  { %1792 = vrot.lane.b32.xlu0 %v1791_v30, %s1816_s1  ;;  %v1586_v62 = vpop.f32.mrb[6].mxu1  ;;  %1704 = vmatprep.subr.bf16.mxu1 %v1703_v39  ;;  %v1116_v20 = vadd.f32 %v1108_v54, %v1098_v31  ;;  %v1092_v27 = vadd.f32 %v1084_v28, %v1074_v12 }
 0x406   :  { %v872_v38 = vpop.f32.mrb[7].mxu1  ;;  %1706 = vmatpush3.bf16.msra.mxu1 %v1703_v39 }
 0x407   :  { %v1796_v50 = vpack.i.bf16 %v1586_v62, %v872_v38  ;;  %v1707_v57 = vpack.c.bf16 %v1586_v62, %v872_v38  ;;  %v1110_v43 = vadd.f32 %v1102_v47, %v1092_v27 }
 0x409   :  { %1797 = vrot.lane.b32.xlu1 %v1796_v50, %s1816_s1  ;;  %1708 = vmatprep.subr.bf16.mxu1 %v1707_v57 }
 0x40a   :  { %1710 = vmatpush3.bf16.msra.mxu1 %v1707_v57 }
 0x40d   :  { %1604 = vmatmul.mubr.msk.f32.vlgmr.msra.gmra.mrb[8].mxu1 %vm380_vm2, %v2259_v5  ;;  %v1117_v5 = vadd.f32 %v1109_v37, %v1099_v11 }
 0x40e   :  { %1606 = vmatprep.mubr.msk.f32.mxu1 %vm380_vm2, %v923_v13 }
 0x411   :  { %1607 = vmatmul.mubr.msk.f32.gmra.mrb[10].mxu1 %vm380_vm2, %v924_v46 }
 0x412   :  { %1609 = vmatprep.mubr.msk.f32.mxu1 %vm380_vm2, %v925_v0 }
 0x415   :  { %1610 = vmatmul.mubr.msk.f32.gmra.mrb[12].mxu1 %vm380_vm2, %v926_v60 }
 0x416   :  { %1612 = vmatprep.mubr.msk.f32.mxu1 %vm380_vm2, %v927_v26 }
 0x419   :  { %1613 = vmatmul.mubr.msk.f32.gmra.mrb[14].mxu1 %vm380_vm2, %v928_v42 }
 0x41a   :  { %1631 = vmatprep.mubr.msk.f32.mxu1 %vm380_vm2, %v1110_v43 }
 0x46f   :  { %v1783_v32 = vpop.permute.xlu0 %1782 }
 0x470   :  { %v1785_v3 = vunpack.i.h.bf16 %v1783_v32  ;;  %v1784_v24 = vunpack.i.l.bf16 %v1783_v32 }
 0x472   :  { %v1711_v49 = vpack.c.bf16 %v1785_v3, %v1784_v24 }
 0x473   :  { %v1788_v22 = vpop.permute.xlu1 %1787 }
 0x474   :  { %v1790_v30 = vunpack.i.h.bf16 %v1788_v22  ;;  %v1789_v39 = vunpack.i.l.bf16 %v1788_v22  ;;  %1712 = vmatprep.subr.bf16.mxu1 %v1711_v49 }
 0x475   :  { %1714 = vmatpush3.bf16.msra.mxu1 %v1711_v49 }
 0x476   :  { %v1715_v44 = vpack.c.bf16 %v1790_v30, %v1789_v39 }
 0x477   :  { %v1793_v53 = vpop.permute.xlu0 %1792 }
 0x478   :  { %v1795_v40 = vunpack.i.h.bf16 %v1793_v53  ;;  %v1794_v58 = vunpack.i.l.bf16 %v1793_v53  ;;  %1716 = vmatprep.subr.bf16.mxu1 %v1715_v44 }
 0x479   :  { %1718 = vmatpush3.bf16.msra.mxu1 %v1715_v44 }
 0x47a   :  { %v1719_v59 = vpack.c.bf16 %v1795_v40, %v1794_v58 }
 0x47b   :  { %v1798_v41 = vpop.permute.xlu1 %1797 }
 0x47c   :  { %v1800_v51 = vunpack.i.h.bf16 %v1798_v41  ;;  %v1799_v18 = vunpack.i.l.bf16 %v1798_v41  ;;  %1720 = vmatprep.subr.bf16.mxu1 %v1719_v59 }
 0x47d   :  { %1722 = vmatpush3.bf16.msra.mxu1 %v1719_v59 }
 0x47e   :  { %v1723_v62 = vpack.c.bf16 %v1800_v51, %v1799_v18 }
 0x480   :  { %1724 = vmatprep.subr.bf16.mxu1 %v1723_v62 }
 0x481   :  { %1726 = vmatpush3.bf16.msra.mxu1 %v1723_v62 }
 0x484   :  { %1632 = vmatmul.mubr.msk.f32.vlgmr.msra.gmra.mrb[8].mxu1 %vm380_vm2, %v2284_v29  ;;  %v1375_v29 = vld [vmem:[%s2415_s7 + $0x1] ss:$0 sm:$0xff] }
 0x485   :  { %1634 = vmatprep.mubr.msk.f32.mxu1 %vm380_vm2, %v2297_v56 }
 0x488   :  { %1635 = vmatmul.mubr.msk.f32.gmra.mrb[10].mxu1 %vm380_vm2, %v2305_v8 }
 0x489   :  { %1637 = vmatprep.mubr.msk.f32.mxu1 %vm380_vm2, %v2320_v25 }
 0x48c   :  { %1638 = vmatmul.mubr.msk.f32.gmra.mrb[12].mxu1 %vm380_vm2, %v2326_v14 }
 0x48d   :  { %1640 = vmatprep.mubr.msk.f32.mxu1 %vm380_vm2, %v1116_v20 }
 0x490   :  { %1641 = vmatmul.mubr.msk.f32.gmra.mrb[14].mxu1 %vm380_vm2, %v1117_v5 }
 0x557   :  { %v1633_v63 = vpop.f32.mrb[8].mxu1 }
 0x558   :  { %v1735_v6 = vadd.f32 %v1633_v63, %v1375_v29  ;;  %v1240_v56 = vpop.f32.mrb[9].mxu1 }
 0x559   :  { %v1736_v38 = vadd.f32 %v1375_v29, %v1240_v56 }
 0x55a   :  { %1288 = vst.msk [vmem:[%s2416_s8 + $0x8] sm:$0xff] %vm46_vm1, %v1735_v6 }
 0x55b   :  { %1287 = vst.msk [vmem:[%s2416_s8] sm:$0xff] %vm46_vm1, %v1736_v38  ;;  %v1636_v2 = vpop.f32.mrb[10].mxu1 }
 0x55c   :  { %v1737_v8 = vadd.f32 %v1636_v2, %v1375_v29  ;;  %v1250_v17 = vpop.f32.mrb[11].mxu1 }
 0x55d   :  { %v1738_v36 = vadd.f32 %v1375_v29, %v1250_v17 }
 0x55e   :  { %1290 = vst.msk [vmem:[%s2416_s8 + $0x18] sm:$0xff] %vm46_vm1, %v1737_v8 }
 0x55f   :  { %1289 = vst.msk [vmem:[%s2416_s8 + $0x10] sm:$0xff] %vm46_vm1, %v1738_v36  ;;  %v1639_v50 = vpop.f32.mrb[12].mxu1 }
 0x560   :  { %v1739_v57 = vadd.f32 %v1639_v50, %v1375_v29  ;;  %v1260_v61 = vpop.f32.mrb[13].mxu1 }
 0x561   :  { %v1740_v15 = vadd.f32 %v1375_v29, %v1260_v61 }
 0x562   :  { %1292 = vst.msk [vmem:[%s2416_s8 + $0x28] sm:$0xff] %vm46_vm1, %v1739_v57 }
 0x563   :  { %1291 = vst.msk [vmem:[%s2416_s8 + $0x20] sm:$0xff] %vm46_vm1, %v1740_v15  ;;  %v1642_v16 = vpop.f32.mrb[14].mxu1 }
 0x564   :  { %v1741_v4 = vadd.f32 %v1642_v16, %v1375_v29  ;;  %v1270_v9 = vpop.f32.mrb[15].mxu1 }
 0x565   :  { %v1742_v10 = vadd.f32 %v1375_v29, %v1270_v9 }
 0x566   :  { %1294 = vst.msk [vmem:[%s2416_s8 + $0x38] sm:$0xff] %vm46_vm1, %v1741_v4 }
 0x567   :  { %1293 = vst.msk [vmem:[%s2416_s8 + $0x30] sm:$0xff] %vm46_vm1, %v1742_v10 }
 0x568   :  { %1299 = vsyncpa [#allocation4], 1 }

</bundles_post_ra>
